<compile_context>
chip_gen: v6e
topology: v6e:2x2x1
jax: 0.10.0
libtpu: 0.0.40
codegen_flags: <defaults>
</compile_context>

<pallas_src>
import functools

import jax
import jax.numpy as jnp
from jax.experimental import pallas as pl
from jax.experimental.pallas import tpu as pltpu

BFA = 0.5
HID = 30        # encoder / decoder hidden width
EST_HID = 10    # estimation hidden width
BN_EPS = 1e-5
COS_EPS = 1e-8
SLAB_W = 128    # lane-dense packed width for inputs, params and outputs

# Bias-band row indices (one 8-row band at the bottom of the parameter blob).
_B1, _B2, _B3, _B4, _BE1, _BE3, _WC, _WE = range(8)


def _rup8(v):
    return ((v + 7) // 8) * 8


def _layout(input_dim, latent):
    """Row-band offsets inside the packed parameter blob (all multiples of 8)."""
    id_pad = _rup8(input_dim)
    hid_pad = _rup8(HID)
    l_pad = _rup8(latent)
    est_pad = _rup8(EST_HID)
    r_w1 = 0                      # fc1          : (input_dim, HID)
    r_w2 = r_w1 + id_pad          # fc21|fc22    : (HID, 2*latent) fused
    r_w3 = r_w2 + hid_pad         # fc3          : (latent, HID)
    r_w4 = r_w3 + l_pad           # fc4          : (HID, input_dim)
    r_we1 = r_w4 + hid_pad        # es1 (z part) : (latent, EST_HID)
    r_we3 = r_we1 + l_pad         # es3          : (EST_HID, n_gmm)
    r_bias = r_we3 + est_pad      # 8-row band: 6 biases + 2 we1 rows (lane 0)
    n_rows = r_bias + 8
    return dict(id_pad=id_pad, hid_pad=hid_pad, l_pad=l_pad, est_pad=est_pad,
                r_w1=r_w1, r_w2=r_w2, r_w3=r_w3, r_w4=r_w4, r_we1=r_we1,
                r_we3=r_we3, r_bias=r_bias, n_rows=n_rows)


def _out_offsets(input_dim, latent):
    o_mu = 0
    o_lv = latent
    o_dec = 2 * latent
    o_gmm = o_dec + input_dim
    o_gamma = o_gmm + latent + 2
    return o_mu, o_lv, o_dec, o_gmm, o_gamma


def rvaebfa_kernel(in_ref, p_ref, out_ref, *, input_dim, latent, n_gmm, bfa):
    L = latent
    ly = _layout(input_dim, L)
    id_pad, hid_pad, est_pad = ly["id_pad"], ly["hid_pad"], ly["est_pad"]
    rb = ly["r_bias"]
    n = in_ref.shape[0]

    # ---- lane-0, 8-aligned-sublane slices (no lane rotates / relayouts) ----
    x = in_ref[:, 0:input_dim]
    eps_noise = in_ref[:, id_pad:id_pad + L]

    w1 = p_ref[ly["r_w1"]:ly["r_w1"] + input_dim, 0:hid_pad]
    w2x = p_ref[ly["r_w2"]:ly["r_w2"] + hid_pad, 0:2 * L]      # fc21 | fc22
    w3 = p_ref[ly["r_w3"]:ly["r_w3"] + L, 0:hid_pad]
    w4 = p_ref[ly["r_w4"]:ly["r_w4"] + hid_pad, 0:input_dim]
    we1z = p_ref[ly["r_we1"]:ly["r_we1"] + L, 0:est_pad]
    we3 = p_ref[ly["r_we3"]:ly["r_we3"] + est_pad, 0:n_gmm]

    b1 = p_ref[rb + _B1:rb + _B1 + 1, 0:hid_pad]
    b2x = p_ref[rb + _B2:rb + _B2 + 1, 0:2 * L]
    b3 = p_ref[rb + _B3:rb + _B3 + 1, 0:hid_pad]
    b4 = p_ref[rb + _B4:rb + _B4 + 1, 0:input_dim]
    be1 = p_ref[rb + _BE1:rb + _BE1 + 1, 0:est_pad]
    be3 = p_ref[rb + _BE3:rb + _BE3 + 1, 0:n_gmm]
    we1_cos = p_ref[rb + _WC:rb + _WC + 1, 0:est_pad]   # we1 row L
    we1_euc = p_ref[rb + _WE:rb + _WE + 1, 0:est_pad]   # we1 row L+1

    # ---------------- Encoder (fc21/fc22 fused into one matmul) -------------
    # Padded hidden columns (30..31) have zero weights + zero bias -> tanh(0)=0,
    # and the matching padded K-rows of w2x are zero, so results are exact.
    h = jnp.tanh(jnp.dot(x, w1, preferred_element_type=jnp.float32) + b1)
    ml = jnp.maximum(
        jnp.dot(h, w2x, preferred_element_type=jnp.float32) + b2x, 0.0)
    mu = ml[:, 0:L]
    logvar = ml[:, L:2 * L]

    # ---------------- Reparameterize ----------------
    std = jnp.exp(0.5 * logvar)
    z_rep = eps_noise * std + mu

    # ---------------- Decoder ----------------
    hd = jnp.tanh(jnp.dot(z_rep, w3, preferred_element_type=jnp.float32) + b3)
    dec = jnp.dot(hd, w4, preferred_element_type=jnp.float32) + b4

    # z is overwritten with mu (as in the PyTorch code)
    z = mu

    # ---------------- Reconstruction statistics (rsqrt form) ----------------
    x2 = jnp.sum(x * x, axis=1, keepdims=True)
    d2 = jnp.sum(dec * dec, axis=1, keepdims=True)
    xd = jnp.sum(x * dec, axis=1, keepdims=True)
    # max(||a||, eps) == sqrt(max(sum(a^2), eps^2)), so 1/that == rsqrt(max(...)).
    rec_cosine = xd * (jax.lax.rsqrt(jnp.maximum(x2, COS_EPS * COS_EPS))
                       * jax.lax.rsqrt(jnp.maximum(d2, COS_EPS * COS_EPS)))
    diff = x - dec
    # NOTE: matches the PyTorch reference -- no epsilon guard on ||x|| here.
    rec_euclidean = (jnp.sqrt(jnp.sum(diff * diff, axis=1, keepdims=True))
                     * jax.lax.rsqrt(x2))

    # Fresh BatchNorm1d in training mode: batch mean, biased variance,
    # eps=1e-5, affine weight=1 / bias=0.
    def batch_norm(v):
        m = jnp.mean(v, axis=0, keepdims=True)
        var = jnp.mean((v - m) * (v - m), axis=0, keepdims=True)
        return (v - m) * jax.lax.rsqrt(var + BN_EPS)

    cos_bn = batch_norm(rec_cosine)
    euc_bn = batch_norm(rec_euclidean)

    # ---------------- Estimation (concat folded into es1 matmul) ------------
    # gmm_input = [(1-BFA)*z, BFA*cos_bn, BFA*euc_bn]; the 3-way concat is
    # folded algebraically: z part via the we1z band, cosine/euclid parts via
    # outer products with the two pre-separated we1 rows (lane 0, bias band).
    he = jnp.tanh(
        (1.0 - bfa) * jnp.dot(z, we1z, preferred_element_type=jnp.float32)
        + (bfa * cos_bn) * we1_cos
        + (bfa * euc_bn) * we1_euc
        + be1)
    # Dropout(p=0.5) -> identity (eval mode).
    logits = jnp.dot(he, we3, preferred_element_type=jnp.float32) + be3
    logits = logits - jnp.max(logits, axis=1, keepdims=True)
    e = jnp.exp(logits)
    gamma = e / jnp.sum(e, axis=1, keepdims=True)   # exact softmax

    # ---------------- Single unmasked full-width store ----------------
    o_mu, o_lv, o_dec, o_gmm, o_gamma = _out_offsets(input_dim, L)
    pad = SLAB_W - (o_gamma + n_gmm)
    pieces = [mu, logvar, dec, (1.0 - bfa) * z, bfa * cos_bn, bfa * euc_bn,
              gamma]
    if pad > 0:
        pieces.append(jnp.zeros((n, pad), jnp.float32))
    out_ref[...] = jnp.concatenate(pieces, axis=1)


def init_linear(key, fan_in, fan_out):
    """PyTorch-style uniform(-1/sqrt(fan_in), 1/sqrt(fan_in)); W as (in, out)."""
    kw, kb = jax.random.split(key)
    bound = 1.0 / jnp.sqrt(float(fan_in))
    w = jax.random.uniform(kw, (fan_in, fan_out), jnp.float32, -bound, bound)
    b = jax.random.uniform(kb, (1, fan_out), jnp.float32, -bound, bound)
    return w, b


def pack_params(params, input_dim, latent, n_gmm):
    """Pack all weights + biases into ONE (rows, 128) row-band blob.

    Every weight/bias starts at lane 0; every weight band starts at an
    8-aligned sublane offset.  Zero padding fills the gaps.
    """
    L = latent
    ly = _layout(input_dim, L)
    assert max(ly["hid_pad"], 2 * L, input_dim, ly["est_pad"],
               n_gmm) <= SLAB_W, "a layer width exceeds 128 lanes"
    P = jnp.zeros((ly["n_rows"], SLAB_W), jnp.float32)

    def put(blob, val, row):
        return jax.lax.dynamic_update_slice(blob, val, (row, 0))

    P = put(P, params["w1"], ly["r_w1"])
    P = put(P, jnp.concatenate([params["w21"], params["w22"]], axis=1),
            ly["r_w2"])
    P = put(P, params["w3"], ly["r_w3"])
    P = put(P, params["w4"], ly["r_w4"])
    P = put(P, params["we1"][0:L, :], ly["r_we1"])
    P = put(P, params["we3"], ly["r_we3"])

    rb = ly["r_bias"]
    P = put(P, params["b1"], rb + _B1)
    P = put(P, jnp.concatenate([params["b21"], params["b22"]], axis=1),
            rb + _B2)
    P = put(P, params["b3"], rb + _B3)
    P = put(P, params["b4"], rb + _B4)
    P = put(P, params["be1"], rb + _BE1)
    P = put(P, params["be3"], rb + _BE3)
    P = put(P, params["we1"][L:L + 1, :], rb + _WC)      # cosine row of es1
    P = put(P, params["we1"][L + 1:L + 2, :], rb + _WE)  # euclid row of es1
    return P


def pack_inputs(x, eps_noise):
    """Pack x and eps_noise into one lane-dense (N, 128) input slab."""
    n, input_dim = x.shape
    id_pad = _rup8(input_dim)
    assert id_pad + eps_noise.shape[1] <= SLAB_W
    slab = jnp.zeros((n, SLAB_W), jnp.float32)
    slab = jax.lax.dynamic_update_slice(slab, x, (0, 0))
    slab = jax.lax.dynamic_update_slice(slab, eps_noise, (0, id_pad))
    return slab


def rvaebfa_forward(in_slab, p_blob, *, input_dim, latent, n_gmm):
    n = in_slab.shape[0]
    L = latent
    o_mu, o_lv, o_dec, o_gmm, o_gamma = _out_offsets(input_dim, L)
    assert o_gamma + n_gmm <= SLAB_W, "output slab exceeds 128 lanes"

    kernel = functools.partial(rvaebfa_kernel, input_dim=input_dim,
                               latent=L, n_gmm=n_gmm, bfa=BFA)

    flops = 2 * n * (input_dim * HID + HID * 2 * L + L * HID
                     + HID * input_dim + L * EST_HID + EST_HID * n_gmm)
    transcendentals = n * (HID + L + HID + EST_HID + n_gmm)
    bytes_accessed = 4 * (in_slab.size + p_blob.size + n * SLAB_W)

    # Tiny problem -> single gridless invocation, whole-array VMEM blocks,
    # 2 input DMAs + 1 output DMA.  (See header note for the batched version.)
    slab = pl.pallas_call(
        kernel,
        out_shape=jax.ShapeDtypeStruct((n, SLAB_W), jnp.float32),
        in_specs=[pl.BlockSpec(memory_space=pltpu.VMEM)] * 2,
        out_specs=pl.BlockSpec(memory_space=pltpu.VMEM),
        cost_estimate=pl.CostEstimate(flops=flops,
                                      transcendentals=transcendentals,
                                      bytes_accessed=bytes_accessed),
    )(in_slab, p_blob)

    mu = slab[:, o_mu:o_mu + L]
    logvar = slab[:, o_lv:o_lv + L]
    dec = slab[:, o_dec:o_dec + input_dim]
    gmm_input = slab[:, o_gmm:o_gmm + L + 2]
    gamma = slab[:, o_gamma:o_gamma + n_gmm]
    z = mu  # z is literally mu in the reference forward -> wrapper plumbing
    return mu, logvar, z, dec, gmm_input, gamma


def rvaebfa_reference(x, eps_noise, params):
    """Pure-JAX reference of RVAEBFA.forward for correctness checking."""
    h = jnp.tanh(x @ params["w1"] + params["b1"])
    mu = jnp.maximum(h @ params["w21"] + params["b21"], 0.0)
    logvar = jnp.maximum(h @ params["w22"] + params["b22"], 0.0)
    std = jnp.exp(0.5 * logvar)
    z_rep = eps_noise * std + mu
    hd = jnp.tanh(z_rep @ params["w3"] + params["b3"])
    dec = hd @ params["w4"] + params["b4"]
    z = mu
    x_norm = jnp.sqrt(jnp.sum(x * x, axis=1, keepdims=True))
    d_norm = jnp.sqrt(jnp.sum(dec * dec, axis=1, keepdims=True))
    rec_cosine = jnp.sum(x * dec, axis=1, keepdims=True) / (
        jnp.maximum(x_norm, COS_EPS) * jnp.maximum(d_norm, COS_EPS))
    diff = x - dec
    rec_euclidean = jnp.sqrt(jnp.sum(diff * diff, axis=1, keepdims=True)) / x_norm

    def bn(v):
        m = jnp.mean(v, axis=0, keepdims=True)
        var = jnp.mean((v - m) ** 2, axis=0, keepdims=True)
        return (v - m) / jnp.sqrt(var + BN_EPS)

    rec_cosine = bn(rec_cosine)
    rec_euclidean = bn(rec_euclidean)
    gmm_input = jnp.concatenate(
        [(1.0 - BFA) * z, BFA * rec_cosine, BFA * rec_euclidean], axis=1)
    he = jnp.tanh(gmm_input @ params["we1"] + params["be1"])
    logits = he @ params["we3"] + params["be3"]
    gamma = jax.nn.softmax(logits, axis=1)
    return mu, logvar, z, dec, gmm_input, gamma


if __name__ == "__main__":
    # Small shapes consistent with the module.
    N = 8            # batch
    INPUT_DIM = 32   # input_dim
    LATENT_DIM = 8   # latent_dim
    N_GMM = 2        # n_gmm

    key = jax.random.PRNGKey(0)
    keys = jax.random.split(key, 10)

    params = {}
    params["w1"], params["b1"] = init_linear(keys[0], INPUT_DIM, HID)         # fc1
    params["w21"], params["b21"] = init_linear(keys[1], HID, LATENT_DIM)      # fc21
    params["w22"], params["b22"] = init_linear(keys[2], HID, LATENT_DIM)      # fc22
    params["w3"], params["b3"] = init_linear(keys[3], LATENT_DIM, HID)        # fc3
    params["w4"], params["b4"] = init_linear(keys[4], HID, INPUT_DIM)         # fc4
    params["we1"], params["be1"] = init_linear(keys[5], LATENT_DIM + 2, EST_HID)  # es1
    params["we3"], params["be3"] = init_linear(keys[6], EST_HID, N_GMM)           # es3

    x = jax.random.normal(keys[7], (N, INPUT_DIM), jnp.float32)
    eps_noise = jax.random.normal(keys[8], (N, LATENT_DIM), jnp.float32)

    # One-time host-side packing: 1 row-band parameter blob, 1 input slab.
    p_blob = pack_params(params, INPUT_DIM, LATENT_DIM, N_GMM)
    in_slab = pack_inputs(x, eps_noise)

    outs = jax.block_until_ready(
        rvaebfa_forward(in_slab, p_blob, input_dim=INPUT_DIM,
                        latent=LATENT_DIM, n_gmm=N_GMM))
    mu, logvar, z, dec, gmm_input, gamma = outs

    assert mu.shape == (N, LATENT_DIM)
    assert logvar.shape == (N, LATENT_DIM)
    assert z.shape == (N, LATENT_DIM)
    assert dec.shape == (N, INPUT_DIM)
    assert gmm_input.shape == (N, LATENT_DIM + 2)
    assert gamma.shape == (N, N_GMM)
    assert bool(jnp.all(jnp.isfinite(gamma)))
    # Exact softmax division -> rows sum to 1 within f32 noise.
    assert bool(jnp.allclose(jnp.sum(gamma, axis=1), 1.0, atol=1e-5))

    # Cross-check against the pure-JAX reference (tightened vs previous rev:
    # no approximate reciprocals remain in the kernel).
    refs = rvaebfa_reference(x, eps_noise, params)
    names = ("mu", "logvar", "z", "dec", "gmm_input", "gamma")
    for name, got, ref in zip(names, outs, refs):
        assert bool(jnp.allclose(got, ref, atol=2e-3, rtol=2e-3)), (
            f"mismatch vs reference: {name}")

    print("KERNEL_OK")
</pallas_src>

<mosaic_0001>
module attributes {stable_mosaic.version = 11 : i64} {
  func.func @rvaebfa_kernel(%arg0: memref<8x128xf32, #tpu.memory_space<vmem>>, %arg1: memref<136x128xf32, #tpu.memory_space<vmem>>, %arg2: memref<8x128xf32, #tpu.memory_space<vmem>>) attributes {dimension_semantics = [], scalar_prefetch = 0 : i64, scratch_operands = 0 : i64, tpu.core_type = #tpu.core_type<tc>} {
    %c0 = arith.constant 0 : index
    %c0_0 = arith.constant 0 : index
    %0 = vector.load %arg0[%c0, %c0_0] : memref<8x128xf32, #tpu.memory_space<vmem>>, vector<8x32xf32>
    %c0_1 = arith.constant 0 : index
    %c32 = arith.constant 32 : index
    %1 = vector.load %arg0[%c0_1, %c32] : memref<8x128xf32, #tpu.memory_space<vmem>>, vector<8x8xf32>
    %c0_2 = arith.constant 0 : index
    %c0_3 = arith.constant 0 : index
    %2 = vector.load %arg1[%c0_2, %c0_3] : memref<136x128xf32, #tpu.memory_space<vmem>>, vector<32x32xf32>
    %c32_4 = arith.constant 32 : index
    %c0_5 = arith.constant 0 : index
    %3 = vector.load %arg1[%c32_4, %c0_5] : memref<136x128xf32, #tpu.memory_space<vmem>>, vector<32x16xf32>
    %c64 = arith.constant 64 : index
    %c0_6 = arith.constant 0 : index
    %4 = vector.load %arg1[%c64, %c0_6] : memref<136x128xf32, #tpu.memory_space<vmem>>, vector<8x32xf32>
    %c72 = arith.constant 72 : index
    %c0_7 = arith.constant 0 : index
    %5 = vector.load %arg1[%c72, %c0_7] : memref<136x128xf32, #tpu.memory_space<vmem>>, vector<32x32xf32>
    %c104 = arith.constant 104 : index
    %c0_8 = arith.constant 0 : index
    %6 = vector.load %arg1[%c104, %c0_8] : memref<136x128xf32, #tpu.memory_space<vmem>>, vector<8x16xf32>
    %c112 = arith.constant 112 : index
    %c0_9 = arith.constant 0 : index
    %7 = vector.load %arg1[%c112, %c0_9] : memref<136x128xf32, #tpu.memory_space<vmem>>, vector<16x2xf32>
    %c128 = arith.constant 128 : index
    %c0_10 = arith.constant 0 : index
    %8 = vector.load %arg1[%c128, %c0_10] : memref<136x128xf32, #tpu.memory_space<vmem>>, vector<1x32xf32>
    %c129 = arith.constant 129 : index
    %c0_11 = arith.constant 0 : index
    %9 = vector.load %arg1[%c129, %c0_11] : memref<136x128xf32, #tpu.memory_space<vmem>>, vector<1x16xf32>
    %c130 = arith.constant 130 : index
    %c0_12 = arith.constant 0 : index
    %10 = vector.load %arg1[%c130, %c0_12] : memref<136x128xf32, #tpu.memory_space<vmem>>, vector<1x32xf32>
    %c131 = arith.constant 131 : index
    %c0_13 = arith.constant 0 : index
    %11 = vector.load %arg1[%c131, %c0_13] : memref<136x128xf32, #tpu.memory_space<vmem>>, vector<1x32xf32>
    %c132 = arith.constant 132 : index
    %c0_14 = arith.constant 0 : index
    %12 = vector.load %arg1[%c132, %c0_14] : memref<136x128xf32, #tpu.memory_space<vmem>>, vector<1x16xf32>
    %c133 = arith.constant 133 : index
    %c0_15 = arith.constant 0 : index
    %13 = vector.load %arg1[%c133, %c0_15] : memref<136x128xf32, #tpu.memory_space<vmem>>, vector<1x2xf32>
    %c134 = arith.constant 134 : index
    %c0_16 = arith.constant 0 : index
    %14 = vector.load %arg1[%c134, %c0_16] : memref<136x128xf32, #tpu.memory_space<vmem>>, vector<1x16xf32>
    %c135 = arith.constant 135 : index
    %c0_17 = arith.constant 0 : index
    %15 = vector.load %arg1[%c135, %c0_17] : memref<136x128xf32, #tpu.memory_space<vmem>>, vector<1x16xf32>
    %cst = arith.constant dense<0.000000e+00> : vector<8x32xf32>
    %16 = tpu.matmul %0, %2, %cst {dimension_numbers = #tpu.dot_dimension_numbers<[1], [0], [0], [1], [0, 0, 1, 1], [], []>} : vector<8x32xf32>, vector<32x32xf32>, vector<8x32xf32> -> vector<8x32xf32>
    %17 = vector.broadcast %8 : vector<1x32xf32> to vector<8x32xf32>
    %18 = arith.addf %16, %17 : vector<8x32xf32>
    %19 = math.tanh %18 : vector<8x32xf32>
    %cst_18 = arith.constant dense<0.000000e+00> : vector<8x16xf32>
    %20 = tpu.matmul %19, %3, %cst_18 {dimension_numbers = #tpu.dot_dimension_numbers<[1], [0], [0], [1], [0, 0, 1, 1], [], []>} : vector<8x32xf32>, vector<32x16xf32>, vector<8x16xf32> -> vector<8x16xf32>
    %21 = vector.broadcast %9 : vector<1x16xf32> to vector<8x16xf32>
    %22 = arith.addf %20, %21 : vector<8x16xf32>
    %cst_19 = arith.constant 0.000000e+00 : f32
    %23 = vector.broadcast %cst_19 : f32 to vector<8x16xf32>
    %24 = arith.maximumf %22, %23 : vector<8x16xf32>
    %25 = vector.extract_strided_slice %24 {offsets = [0, 0], sizes = [8, 8], strides = [1, 1]} : vector<8x16xf32> to vector<8x8xf32>
    %26 = vector.extract_strided_slice %24 {offsets = [0, 8], sizes = [8, 8], strides = [1, 1]} : vector<8x16xf32> to vector<8x8xf32>
    %cst_20 = arith.constant 5.000000e-01 : f32
    %27 = vector.broadcast %cst_20 : f32 to vector<8x8xf32>
    %28 = arith.mulf %27, %26 : vector<8x8xf32>
    %29 = math.exp %28 : vector<8x8xf32>
    %30 = arith.mulf %1, %29 : vector<8x8xf32>
    %31 = arith.addf %30, %25 : vector<8x8xf32>
    %cst_21 = arith.constant dense<0.000000e+00> : vector<8x32xf32>
    %32 = tpu.matmul %31, %4, %cst_21 {dimension_numbers = #tpu.dot_dimension_numbers<[1], [0], [0], [1], [0, 0, 1, 1], [], []>} : vector<8x8xf32>, vector<8x32xf32>, vector<8x32xf32> -> vector<8x32xf32>
    %33 = vector.broadcast %10 : vector<1x32xf32> to vector<8x32xf32>
    %34 = arith.addf %32, %33 : vector<8x32xf32>
    %35 = math.tanh %34 : vector<8x32xf32>
    %cst_22 = arith.constant dense<0.000000e+00> : vector<8x32xf32>
    %36 = tpu.matmul %35, %5, %cst_22 {dimension_numbers = #tpu.dot_dimension_numbers<[1], [0], [0], [1], [0, 0, 1, 1], [], []>} : vector<8x32xf32>, vector<32x32xf32>, vector<8x32xf32> -> vector<8x32xf32>
    %37 = vector.broadcast %11 : vector<1x32xf32> to vector<8x32xf32>
    %38 = arith.addf %36, %37 : vector<8x32xf32>
    %39 = arith.mulf %0, %0 : vector<8x32xf32>
    %cst_23 = arith.constant dense<0.000000e+00> : vector<8xf32>
    %40 = vector.multi_reduction <add>, %39, %cst_23 [1] : vector<8x32xf32> to vector<8xf32>
    %41 = vector.shape_cast %40 : vector<8xf32> to vector<8x1xf32>
    %42 = arith.mulf %38, %38 : vector<8x32xf32>
    %cst_24 = arith.constant dense<0.000000e+00> : vector<8xf32>
    %43 = vector.multi_reduction <add>, %42, %cst_24 [1] : vector<8x32xf32> to vector<8xf32>
    %44 = vector.shape_cast %43 : vector<8xf32> to vector<8x1xf32>
    %45 = arith.mulf %0, %38 : vector<8x32xf32>
    %cst_25 = arith.constant dense<0.000000e+00> : vector<8xf32>
    %46 = vector.multi_reduction <add>, %45, %cst_25 [1] : vector<8x32xf32> to vector<8xf32>
    %47 = vector.shape_cast %46 : vector<8xf32> to vector<8x1xf32>
    %cst_26 = arith.constant 1.000000e-16 : f32
    %48 = vector.broadcast %cst_26 : f32 to vector<8x1xf32>
    %49 = arith.maximumf %41, %48 : vector<8x1xf32>
    %50 = math.rsqrt %49 : vector<8x1xf32>
    %cst_27 = arith.constant 1.000000e-16 : f32
    %51 = vector.broadcast %cst_27 : f32 to vector<8x1xf32>
    %52 = arith.maximumf %44, %51 : vector<8x1xf32>
    %53 = math.rsqrt %52 : vector<8x1xf32>
    %54 = arith.mulf %50, %53 : vector<8x1xf32>
    %55 = arith.mulf %47, %54 : vector<8x1xf32>
    %56 = arith.subf %0, %38 : vector<8x32xf32>
    %57 = arith.mulf %56, %56 : vector<8x32xf32>
    %cst_28 = arith.constant dense<0.000000e+00> : vector<8xf32>
    %58 = vector.multi_reduction <add>, %57, %cst_28 [1] : vector<8x32xf32> to vector<8xf32>
    %59 = vector.shape_cast %58 : vector<8xf32> to vector<8x1xf32>
    %60 = math.sqrt %59 : vector<8x1xf32>
    %61 = math.rsqrt %41 : vector<8x1xf32>
    %62 = arith.mulf %60, %61 : vector<8x1xf32>
    %cst_29 = arith.constant dense<0.000000e+00> : vector<1xf32>
    %63 = vector.multi_reduction <add>, %55, %cst_29 [0] : vector<8x1xf32> to vector<1xf32>
    %64 = vector.shape_cast %63 : vector<1xf32> to vector<1x1xf32>
    %cst_30 = arith.constant 8.000000e+00 : f32
    %65 = vector.broadcast %cst_30 : f32 to vector<1x1xf32>
    %66 = arith.divf %64, %65 : vector<1x1xf32>
    %67 = vector.broadcast %66 : vector<1x1xf32> to vector<8x1xf32>
    %68 = arith.subf %55, %67 : vector<8x1xf32>
    %69 = vector.broadcast %66 : vector<1x1xf32> to vector<8x1xf32>
    %70 = arith.subf %55, %69 : vector<8x1xf32>
    %71 = arith.mulf %68, %70 : vector<8x1xf32>
    %cst_31 = arith.constant dense<0.000000e+00> : vector<1xf32>
    %72 = vector.multi_reduction <add>, %71, %cst_31 [0] : vector<8x1xf32> to vector<1xf32>
    %73 = vector.shape_cast %72 : vector<1xf32> to vector<1x1xf32>
    %cst_32 = arith.constant 8.000000e+00 : f32
    %74 = vector.broadcast %cst_32 : f32 to vector<1x1xf32>
    %75 = arith.divf %73, %74 : vector<1x1xf32>
    %76 = vector.broadcast %66 : vector<1x1xf32> to vector<8x1xf32>
    %77 = arith.subf %55, %76 : vector<8x1xf32>
    %cst_33 = arith.constant 9.99999974E-6 : f32
    %78 = vector.broadcast %cst_33 : f32 to vector<1x1xf32>
    %79 = arith.addf %75, %78 : vector<1x1xf32>
    %80 = math.rsqrt %79 : vector<1x1xf32>
    %81 = vector.broadcast %80 : vector<1x1xf32> to vector<8x1xf32>
    %82 = arith.mulf %77, %81 : vector<8x1xf32>
    %cst_34 = arith.constant dense<0.000000e+00> : vector<1xf32>
    %83 = vector.multi_reduction <add>, %62, %cst_34 [0] : vector<8x1xf32> to vector<1xf32>
    %84 = vector.shape_cast %83 : vector<1xf32> to vector<1x1xf32>
    %cst_35 = arith.constant 8.000000e+00 : f32
    %85 = vector.broadcast %cst_35 : f32 to vector<1x1xf32>
    %86 = arith.divf %84, %85 : vector<1x1xf32>
    %87 = vector.broadcast %86 : vector<1x1xf32> to vector<8x1xf32>
    %88 = arith.subf %62, %87 : vector<8x1xf32>
    %89 = vector.broadcast %86 : vector<1x1xf32> to vector<8x1xf32>
    %90 = arith.subf %62, %89 : vector<8x1xf32>
    %91 = arith.mulf %88, %90 : vector<8x1xf32>
    %cst_36 = arith.constant dense<0.000000e+00> : vector<1xf32>
    %92 = vector.multi_reduction <add>, %91, %cst_36 [0] : vector<8x1xf32> to vector<1xf32>
    %93 = vector.shape_cast %92 : vector<1xf32> to vector<1x1xf32>
    %cst_37 = arith.constant 8.000000e+00 : f32
    %94 = vector.broadcast %cst_37 : f32 to vector<1x1xf32>
    %95 = arith.divf %93, %94 : vector<1x1xf32>
    %96 = vector.broadcast %86 : vector<1x1xf32> to vector<8x1xf32>
    %97 = arith.subf %62, %96 : vector<8x1xf32>
    %cst_38 = arith.constant 9.99999974E-6 : f32
    %98 = vector.broadcast %cst_38 : f32 to vector<1x1xf32>
    %99 = arith.addf %95, %98 : vector<1x1xf32>
    %100 = math.rsqrt %99 : vector<1x1xf32>
    %101 = vector.broadcast %100 : vector<1x1xf32> to vector<8x1xf32>
    %102 = arith.mulf %97, %101 : vector<8x1xf32>
    %cst_39 = arith.constant dense<0.000000e+00> : vector<8x16xf32>
    %103 = tpu.matmul %25, %6, %cst_39 {dimension_numbers = #tpu.dot_dimension_numbers<[1], [0], [0], [1], [0, 0, 1, 1], [], []>} : vector<8x8xf32>, vector<8x16xf32>, vector<8x16xf32> -> vector<8x16xf32>
    %cst_40 = arith.constant 5.000000e-01 : f32
    %104 = vector.broadcast %cst_40 : f32 to vector<8x16xf32>
    %105 = arith.mulf %104, %103 : vector<8x16xf32>
    %cst_41 = arith.constant 5.000000e-01 : f32
    %106 = vector.broadcast %cst_41 : f32 to vector<8x1xf32>
    %107 = arith.mulf %106, %82 : vector<8x1xf32>
    %108 = vector.broadcast %107 : vector<8x1xf32> to vector<8x16xf32>
    %109 = vector.broadcast %14 : vector<1x16xf32> to vector<8x16xf32>
    %110 = arith.mulf %108, %109 : vector<8x16xf32>
    %111 = arith.addf %105, %110 : vector<8x16xf32>
    %cst_42 = arith.constant 5.000000e-01 : f32
    %112 = vector.broadcast %cst_42 : f32 to vector<8x1xf32>
    %113 = arith.mulf %112, %102 : vector<8x1xf32>
    %114 = vector.broadcast %113 : vector<8x1xf32> to vector<8x16xf32>
    %115 = vector.broadcast %15 : vector<1x16xf32> to vector<8x16xf32>
    %116 = arith.mulf %114, %115 : vector<8x16xf32>
    %117 = arith.addf %111, %116 : vector<8x16xf32>
    %118 = vector.broadcast %12 : vector<1x16xf32> to vector<8x16xf32>
    %119 = arith.addf %117, %118 : vector<8x16xf32>
    %120 = math.tanh %119 : vector<8x16xf32>
    %cst_43 = arith.constant dense<0.000000e+00> : vector<8x2xf32>
    %121 = tpu.matmul %120, %7, %cst_43 {dimension_numbers = #tpu.dot_dimension_numbers<[1], [0], [0], [1], [0, 0, 1, 1], [], []>} : vector<8x16xf32>, vector<16x2xf32>, vector<8x2xf32> -> vector<8x2xf32>
    %122 = vector.broadcast %13 : vector<1x2xf32> to vector<8x2xf32>
    %123 = arith.addf %121, %122 : vector<8x2xf32>
    %cst_44 = arith.constant dense<0xFF800000> : vector<8xf32>
    %124 = vector.multi_reduction <maximumf>, %123, %cst_44 [1] : vector<8x2xf32> to vector<8xf32>
    %125 = vector.shape_cast %124 : vector<8xf32> to vector<8x1xf32>
    %126 = vector.broadcast %125 : vector<8x1xf32> to vector<8x2xf32>
    %127 = arith.subf %123, %126 : vector<8x2xf32>
    %128 = math.exp %127 : vector<8x2xf32>
    %cst_45 = arith.constant dense<0.000000e+00> : vector<8xf32>
    %129 = vector.multi_reduction <add>, %128, %cst_45 [1] : vector<8x2xf32> to vector<8xf32>
    %130 = vector.shape_cast %129 : vector<8xf32> to vector<8x1xf32>
    %131 = vector.broadcast %130 : vector<8x1xf32> to vector<8x2xf32>
    %132 = arith.divf %128, %131 : vector<8x2xf32>
    %cst_46 = arith.constant 5.000000e-01 : f32
    %133 = vector.broadcast %cst_46 : f32 to vector<8x8xf32>
    %134 = arith.mulf %133, %25 : vector<8x8xf32>
    %cst_47 = arith.constant 5.000000e-01 : f32
    %135 = vector.broadcast %cst_47 : f32 to vector<8x1xf32>
    %136 = arith.mulf %135, %82 : vector<8x1xf32>
    %cst_48 = arith.constant 5.000000e-01 : f32
    %137 = vector.broadcast %cst_48 : f32 to vector<8x1xf32>
    %138 = arith.mulf %137, %102 : vector<8x1xf32>
    %cst_49 = arith.constant 0.000000e+00 : f32
    %139 = vector.broadcast %cst_49 : f32 to vector<8x68xf32>
    %140 = tpu.concatenate %25, %26, %38, %134, %136, %138, %132, %139 in 1 : vector<8x8xf32>, vector<8x8xf32>, vector<8x32xf32>, vector<8x8xf32>, vector<8x1xf32>, vector<8x1xf32>, vector<8x2xf32>, vector<8x68xf32> -> vector<8x128xf32>
    %c0_50 = arith.constant 0 : index
    %c0_51 = arith.constant 0 : index
    %141 = vector.load %arg2[%c0_50, %c0_51] : memref<8x128xf32, #tpu.memory_space<vmem>>, vector<8x128xf32>
    tpu.vector_store %arg2[%c0_50, %c0_51], %140 {strides = array<i32>} : memref<8x128xf32, #tpu.memory_space<vmem>>, vector<8x128xf32>,
    return
  }
}

</mosaic_0001>

<bundles_post_ra>
// kernel: tpu_custom_call.1
= control target key start
LH: loop header
LB: loop body
LE: loop exit
PB: predicated region body
PF: predicated region fallthrough
CT: control target
= control target key end

     0   :  { %7 = vsyncpa [#allocation3], 0  ;;  %s976_s0 = inlined_call_operand.hbm [shape: f32[8,128], index: 0, kind: input, shape index: {}]   ;;  %s977_s1 = inlined_call_operand.hbm [shape: f32[136,128], index: 1, kind: input, shape index: {}]   ;;  %s978_s2 = inlined_call_operand.hbm [shape: f32[8,128], index: 2, kind: output, shape index: {}]  }
   0x1   :  { %8 = vsyncpa [#allocation6], 0 }
   0x2   :  { %9 = vsyncpa [#allocation4], 0  ;;  %s874_s9 = smov [#allocation2]   ;;  %s875_s11 = smov [#allocation5]  }
   0x3   :  { %s16_s10 = sshll.u32 %s874_s9, 4  ;;  %s25_s12 = sshll.u32 %s875_s11, 4  ;;  %s17_s10 = int_to_ptr.vmem [resolvable:$true] %s16_s10  ;;  %s26_s12 = int_to_ptr.vmem [resolvable:$true] %s25_s12 }
   0x4   :  { %s816_s13 = scalar_lea.vmem %s17_s10, 128  ;;  %p821_p1 = scmp.lt.s32.totalorder %s17_s10, %s17_s10 }
   0x5   :  { %p817_p0 = scmp.ne.s32.totalorder %s17_s10, %s816_s13  ;;  %p822_p2 = scmp.lt.s32.totalorder %s816_s13, %s816_s13 }
   0x7   :  { %p823_p3 = por %p822_p2, %p821_p1 }
   0x9   :  { %p824_p4 = pnand %p823_p3, %p817_p0 }
   0xb   :  { %827 = shalt.err (!%p824_p4)
}
   0xc   :  { %19 = dma.hbm_to_vmem [thread:$0]  %s976_s0, 128, %s17_s10, [#allocation3]  }
   0xd   :  { %s836_s16 = scalar_lea.vmem %s26_s12, 2176  ;;  %p841_p6 = scmp.lt.s32.totalorder %s26_s12, %s26_s12 }
   0xe   :  { %p837_p5 = scmp.ne.s32.totalorder %s26_s12, %s836_s16  ;;  %p842_p7 = scmp.lt.s32.totalorder %s836_s16, %s836_s16 }
  0x10   :  { %p843_p8 = por %p842_p7, %p841_p6 }
  0x12   :  { %p844_p9 = pnand %p843_p8, %p837_p5 }
  0x14   :  { %847 = shalt.err (!%p844_p9)
}
  0x15   :  { %s876_s17 = smov 128   ;;  %s877_s18 = smov 8  }
  0x16   :  { %31 = dma.hbm_to_vmem [thread:$0]  %s977_s1, 2176, %s26_s12, [#allocation6], %s876_s17, %s876_s17, %s877_s18  }
  0x17   :  { %868 = dma.done.wait [#allocation3], 128  }
  0x18   :  { %869 = vsyncadd [#allocation3], 4294967168 }
  0x19   :  { %870 = dma.done.wait [#allocation6], 2176  }
  0x1a   :  { %871 = vsyncadd [#allocation6], 4294965120  ;;  %v878_v0 = vmov 0.0   ;;  %vm879_vm0 = vmmov 0   ;;  %v42_v1 = vld [vmem:[#allocation5 + $0x18] sm:$0xff]  ;;  %v41_v2 = vld [vmem:[#allocation5 + $0x10] sm:$0xff] }
  0x1b   :  { %721 = vmatprep.subr.mxu0 %v878_v0  ;;  %729 = vmatprep.mubr.msk.f32.mxu0 %vm879_vm0, %v878_v0  ;;  %v40_v3 = vld [vmem:[#allocation5 + $0x8] sm:$0xff]  ;;  %v39_v4 = vld [vmem:[#allocation5] sm:$0xff]  ;;  %v916_v5 = vld [vmem:[#allocation2] sm:$0xff]  ;;  %vm67_vm1 = vcmask 261120   ;;  %s880_s0 = smov 24   ;;  %s881_s1 = smov 32  }
  0x1c   :  { %732 = vmatprep.subr.mxu1 %v878_v0  ;;  %740 = vmatprep.mubr.msk.f32.mxu1 %vm879_vm0, %v878_v0  ;;  %v46_v6 = vld [vmem:[#allocation5 + $0x38] sm:$0xff]  ;;  %v45_v7 = vld [vmem:[#allocation5 + $0x30] sm:$0xff]  ;;  %v44_v8 = vld [vmem:[#allocation5 + $0x28] sm:$0xff]  ;;  %s882_s21 = smov 96   ;;  %vm240_vm2 = vcmask 64512   ;;  %v391_v41 = vmul.f32 %v916_v5, %v916_v5  ;;  %vm559_vm5 = vcmask 130048  }
  0x1d   :  { %722 = vmatpush3.msra.mxu0 %v42_v1  ;;  %733 = vmatpush3.msra.mxu1 %v46_v6  ;;  %v43_v9 = vld [vmem:[#allocation5 + $0x20] sm:$0xff]  ;;  %v52_v28 = vld [vmem:[#allocation5 + $0x68] sm:$0xff]  ;;  %v50_v31 = vld [vmem:[#allocation5 + $0x58] sm:$0xff]  ;;  %vm633_vm6 = vcmask 15360   ;;  %s883_s22 = smov 16   ;;  %s884_s23 = smov 48  }
  0x1e   :  { %723 = vmatprep.subr.mxu0 %v878_v0  ;;  %734 = vmatprep.subr.mxu1 %v878_v0  ;;  %v685_v10 = vld [vmem:[#allocation5 + $0x80] ss:$0 sm:$0xff]  ;;  %v687_v15 = vld [vmem:[#allocation5 + $0x81] ss:$0 sm:$0xff]  ;;  %v49_v32 = vld [vmem:[#allocation5 + $0x50] sm:$0xff]  ;;  %v392_v42 = vsel %vm67_vm1, %v391_v41, 0.0 }
  0x1f   :  { %724 = vmatpush3.msra.mxu0 %v41_v2  ;;  %735 = vmatpush3.msra.mxu1 %v45_v7  ;;  %v47_v22 = vld [vmem:[#allocation5 + $0x40] sm:$0xff]  ;;  %v48_v33 = vld [vmem:[#allocation5 + $0x48] sm:$0xff]  ;;  %v54_v54 = vld [vmem:[#allocation5 + $0x78] sm:$0xff]  ;;  %s885_s24 = smov 58   ;;  %vm658_vm7 = vcmask 392192   ;;  %vm660_vm8 = vcmask 457728  }
  0x20   :  { %725 = vmatprep.subr.mxu0 %v878_v0  ;;  %736 = vmatprep.subr.mxu1 %v878_v0  ;;  %v51_v30 = vld [vmem:[#allocation5 + $0x60] sm:$0xff]  ;;  %v53_v55 = vld [vmem:[#allocation5 + $0x70] sm:$0xff]  ;;  %vm662_vm9 = vcmask 465920   ;;  %vm664_vm10 = vcmask 474112   ;;  %s886_s25 = smov [#allocation7]   ;;  %vm666_vm11 = vcmask 490496  }
  0x21   :  { %726 = vmatpush3.msra.mxu0 %v40_v3  ;;  %737 = vmatpush3.msra.mxu1 %v44_v8  ;;  %v689_v34 = vld [vmem:[#allocation5 + $0x82] ss:$0 sm:$0xff]  ;;  %v691_v43 = vld [vmem:[#allocation5 + $0x83] ss:$0 sm:$0xff]  ;;  %s675_s26 = sshll.u32 %s886_s25, 4  ;;  %s676_s26 = int_to_ptr.vmem [resolvable:$true] %s675_s26 }
  0x22   :  { %727 = vmatprep.subr.mxu0 %v878_v0  ;;  %738 = vmatprep.subr.mxu1 %v878_v0  ;;  %s848_s27 = scalar_lea.vmem %s676_s26, 128  ;;  %p853_p11 = scmp.lt.s32.totalorder %s676_s26, %s676_s26 }
  0x23   :  { %728 = vmatpush3.msra.mxu0 %v39_v4  ;;  %739 = vmatpush3.msra.mxu1 %v43_v9  ;;  %p849_p10 = scmp.ne.s32.totalorder %s676_s26, %s848_s27  ;;  %p854_p12 = scmp.lt.s32.totalorder %s848_s27, %s848_s27 }
  0x24   :  { %730 = vmatmul.mubr.msk.f32.vlgmr.msra.gmra.mxu0 %vm67_vm1, %v916_v5  ;;  %743 = vmatprep.subr.mxu0 %v878_v0 }
  0x25   :  { %745 = vmatprep.mubr.msk.f32.mxu0 %vm879_vm0, %v878_v0  ;;  %748 = vmatprep.subr.mxu1 %v878_v0  ;;  %p855_p13 = por %p854_p12, %p853_p11 }
  0x26   :  { %744 = vmatpush3.msra.mxu0 %v47_v22 }
  0x27   :  { %759 = vmatprep.subr.mxu0 %v878_v0  ;;  %p856_p0 = pnand %p855_p13, %p849_p10 }
  0xe4   :  { %v137_v11 = vpop.f32.mrf.mxu0 }
  0xe5   :  { %v138_v12 = vadd.f32 %v685_v10, %v137_v11 }
  0xe6   :  { %v731_v13 = vpop.f32.mrf.mxu0 }
  0xe7   :  { %784 = vtanh.f32 %v138_v12 }
  0xf4   :  { %v785_v14 = vpop.eup %784 }
  0xf5   :  { %741 = vmatmul.mubr.msk.f32.vlgmr.msra.gmra.mxu1 %vm67_vm1, %v785_v14 }
  0xf6   :  { %756 = vmatprep.mubr.msk.f32.mxu1 %vm879_vm0, %v878_v0  ;;  %749 = vmatpush3.msra.mxu1 %v51_v30 }
  0xf7   :  { %750 = vmatprep.subr.mxu1 %v878_v0 }
  0xf8   :  { %751 = vmatpush3.msra.mxu1 %v50_v31 }
  0xf9   :  { %752 = vmatprep.subr.mxu1 %v878_v0 }
  0xfa   :  { %753 = vmatpush3.msra.mxu1 %v49_v32 }
  0xfb   :  { %754 = vmatprep.subr.mxu1 %v878_v0 }
  0xfc   :  { %755 = vmatpush3.msra.mxu1 %v48_v33 }
 0x1b5   :  { %v215_v16 = vpop.f32.mrf.mxu1 }
 0x1b6   :  { %v216_v17 = vadd.f32 %v687_v15, %v215_v16 }
 0x1b7   :  { %v742_v18 = vpop.f32.mrf.mxu1 }
 0x1b8   :  { %v931_v19 = vmax.f32 %v216_v17, 0.0 }
 0x1ba   :  { %v934_v20 = vmul.f32 0.5, %v931_v19 }
 0x1bc   :  { %v221_v21 = vmul.f32 1.442695, %v934_v20 }
 0x1be   :  { %786 = vpow2.f32 %v221_v21 }
 0x1cb   :  { %v787_v23 = vpop.eup %786 }
 0x1cc   :  { %224 = vrot.lane.b32.xlu0 %v787_v23, %s880_s0 }
 0x1d0   :  { %229 = vrot.lane.b32.xlu0 %v931_v19, %s881_s1 }
 0x23e   :  { %v225_v24 = vpop.permute.xlu0 %224 }
 0x23f   :  { %v227_v25 = vmul.f32 %v225_v24, %v916_v5 }
 0x242   :  { %v230_v26 = vpop.permute.xlu0 %229 }
 0x243   :  { %v232_v27 = vadd.f32 %v230_v26, %v227_v25 }
 0x245   :  { %238 = vrot.lane.b32.xlu1 %v232_v27, %s882_s21 }
 0x269   :  { %393 = vadd.xlane.f32.xlu1 %v392_v42 }
 0x2b7   :  { %v239_v29 = vpop.permute.xlu1 %238 }
 0x2b8   :  { %746 = vmatmul.mubr.msk.f32.vlgmr.msra.gmra.mxu0 %vm240_vm2, %v239_v29 }
 0x2b9   :  { %760 = vmatpush3.msra.mxu0 %v52_v28  ;;  %761 = vmatprep.mubr.msk.f32.mxu0 %vm879_vm0, %v878_v0 }
 0x2ba   :  { %764 = vmatprep.subr.mxu0 %v878_v0 }
 0x2bc   :  { %762 = vmatmul.mubr.msk.f32.vlgmr.msra.gmra.mxu0 %vm240_vm2, %v931_v19 }
 0x2bd   :  { %768 = vmatprep.mubr.msk.f32.mxu0 %vm879_vm0, %v878_v0  ;;  %765 = vmatpush3.msra.mxu0 %v54_v54  ;;  %v695_v54 = vld [vmem:[#allocation5 + $0x87] ss:$0 sm:$0xff] }
 0x2be   :  { %766 = vmatprep.subr.mxu0 %v878_v0 }
 0x2bf   :  { %767 = vmatpush3.msra.mxu0 %v53_v55 }
 0x2f2   :  { %v394_v56 = vpop.xlane.xlu1 %393 }
 0x2f3   :  { %v403_v57 = vmax.f32 %v394_v56, 1e-16 }
 0x378   :  { %v309_v35 = vpop.f32.mrf.mxu0 }
 0x379   :  { %v310_v36 = vadd.f32 %v689_v34, %v309_v35 }
 0x37a   :  { %v747_v37 = vpop.f32.mrf.mxu0 }
 0x37b   :  { %788 = vtanh.f32 %v310_v36 }
 0x37c   :  { %v949_v38 = vpop.f32.mrf.mxu0  ;;  %790 = vrsqrt.f32 %v403_v57 }
 0x37d   :  { %v534_v55 = vmul.f32 0.5, %v949_v38 }
 0x37e   :  { %v763_v39 = vpop.f32.mrf.mxu0 }
 0x388   :  { %v789_v40 = vpop.eup %788 }
 0x389   :  { %757 = vmatmul.mubr.msk.f32.vlgmr.msra.gmra.mxu1 %vm67_vm1, %v789_v40  ;;  %v791_v61 = vpop.eup %790 }
 0x449   :  { %v387_v44 = vpop.f32.mrf.mxu1 }
 0x44a   :  { %v955_v45 = vadd.f32 %v691_v43, %v387_v44 }
 0x44b   :  { %v758_v46 = vpop.f32.mrf.mxu1 }
 0x44c   :  { %v399_v47 = vmul.f32 %v955_v45, %v916_v5  ;;  %v395_v48 = vmul.f32 %v955_v45, %v955_v45  ;;  %v409_v49 = vsub.f32 %v916_v5, %v955_v45 }
 0x44e   :  { %v400_v50 = vsel %vm67_vm1, %v399_v47, 0.0  ;;  %v396_v51 = vsel %vm67_vm1, %v395_v48, 0.0  ;;  %v410_v52 = vmul.f32 %v409_v49, %v409_v49  ;;  %v694_v49 = vld [vmem:[#allocation5 + $0x86] ss:$0 sm:$0xff] }
 0x44f   :  { %401 = vadd.xlane.f32.xlu1 %v400_v50  ;;  %397 = vadd.xlane.f32.xlu0 %v396_v51 }
 0x450   :  { %v411_v53 = vsel %vm67_vm1, %v410_v52, 0.0 }
 0x453   :  { %412 = vadd.xlane.f32.xlu0 %v411_v53 }
 0x4d8   :  { %v398_v58 = vpop.xlane.xlu0 %397  ;;  %v402_v2 = vpop.xlane.xlu1 %401 }
 0x4d9   :  { %v405_v59 = vmax.f32 %v398_v58, 1e-16 }
 0x4db   :  { %792 = vrsqrt.f32 %v405_v59  ;;  %v696_v59 = vld [vmem:[#allocation5 + $0x84] ss:$0 sm:$0xff] }
 0x4dc   :  { %v413_v60 = vpop.xlane.xlu0 %412 }
 0x4dd   :  { %794 = vrsqrt.f32 %v413_v60  ;;  %vm416_vm3 = vcmp.eq.f32.partialorder %v413_v60, inf  ;;  %v419_v5 = vand.u32 2147483648, %v413_v60  ;;  %vm418_vm4 = vcmp.eq.f32.partialorder %v413_v60, 0.0 }
 0x4de   :  { %796 = vrsqrt.f32 %v394_v56 }
 0x4e8   :  { %v793_v62 = vpop.eup %792 }
 0x4e9   :  { %v407_v63 = vmul.f32 %v793_v62, %v791_v61 }
 0x4ea   :  { %v795_v1 = vpop.eup %794 }
 0x4eb   :  { %v408_v3 = vmul.f32 %v407_v63, %v402_v2  ;;  %v415_v4 = vmul.f32 %v795_v1, %v413_v60  ;;  %v797_v7 = vpop.eup %796  ;;  %v697_v63 = vld [vmem:[#allocation5 + $0x85] ss:$0 sm:$0xff] }
 0x4ed   :  { %v423_v0 = vrot.slane %v408_v3, 4  ;;  %v417_v6 = vsel %vm416_vm3, %v413_v60, %v415_v4 }
 0x4ee   :  { %v420_v8 = vsel %vm418_vm4, %v419_v5, %v417_v6 }
 0x4ef   :  { %v424_v9 = vadd.f32 %v423_v0, %v408_v3  ;;  %v422_v10 = vmul.f32 %v797_v7, %v420_v8 }
 0x4f1   :  { %v425_v11 = vrot.slane %v424_v9, 2  ;;  %v443_v12 = vrot.slane %v422_v10, 4 }
 0x4f3   :  { %v426_v13 = vadd.f32 %v425_v11, %v424_v9  ;;  %v444_v14 = vadd.f32 %v443_v12, %v422_v10 }
 0x4f5   :  { %v427_v15 = vrot.slane %v426_v13, 1  ;;  %v445_v16 = vrot.slane %v444_v14, 2 }
 0x4f7   :  { %v428_v17 = vadd.f32 %v427_v15, %v426_v13  ;;  %v446_v18 = vadd.f32 %v445_v16, %v444_v14 }
 0x4f9   :  { %v430_v21 = vmul.f32 0.125, %v428_v17  ;;  %v447_v22 = vrot.slane %v446_v18, 1 }
 0x4fb   :  { %v431_v23 = vsub.f32 %v408_v3, %v430_v21  ;;  %v448_v24 = vadd.f32 %v447_v22, %v446_v18 }
 0x4fd   :  { %v432_v25 = vmul.f32 %v431_v23, %v431_v23  ;;  %v449_v26 = vmul.f32 0.125, %v448_v24 }
 0x4ff   :  { %v433_v27 = vrot.slane %v432_v25, 4  ;;  %v450_v28 = vsub.f32 %v422_v10, %v449_v26 }
 0x501   :  { %v434_v29 = vadd.f32 %v433_v27, %v432_v25  ;;  %v451_v30 = vmul.f32 %v450_v28, %v450_v28 }
 0x503   :  { %v435_v31 = vrot.slane %v434_v29, 2  ;;  %v452_v32 = vrot.slane %v451_v30, 4 }
 0x505   :  { %v436_v33 = vadd.f32 %v435_v31, %v434_v29  ;;  %v453_v34 = vadd.f32 %v452_v32, %v451_v30 }
 0x507   :  { %v437_v35 = vrot.slane %v436_v33, 1  ;;  %v454_v36 = vrot.slane %v453_v34, 2 }
 0x509   :  { %v438_v37 = vadd.f32 %v437_v35, %v436_v33  ;;  %v455_v39 = vadd.f32 %v454_v36, %v453_v34 }
 0x50b   :  { %v439_v40 = vmul.f32 0.125, %v438_v37  ;;  %v456_v41 = vrot.slane %v455_v39, 1 }
 0x50d   :  { %v440_v42 = vadd.f32 1e-05, %v439_v40  ;;  %v457_v43 = vadd.f32 %v456_v41, %v455_v39 }
 0x50f   :  { %798 = vrsqrt.f32 %v440_v42  ;;  %v458_v44 = vmul.f32 0.125, %v457_v43 }
 0x511   :  { %v459_v46 = vadd.f32 1e-05, %v458_v44 }
 0x513   :  { %800 = vrsqrt.f32 %v459_v46 }
 0x51c   :  { %v799_v47 = vpop.eup %798 }
 0x51d   :  { %v442_v48 = vmul.f32 %v799_v47, %v431_v23 }
 0x51f   :  { %v535_v50 = vmul.f32 0.5, %v442_v48 }
 0x520   :  { %v801_v51 = vpop.eup %800 }
 0x521   :  { %v540_v52 = vmul.f32 %v694_v49, %v535_v50  ;;  %v461_v53 = vmul.f32 %v801_v51, %v450_v28 }
 0x523   :  { %v542_v56 = vmul.f32 0.5, %v461_v53  ;;  %v541_v57 = vadd.f32 %v540_v52, %v534_v55 }
 0x525   :  { %v547_v58 = vmul.f32 %v695_v54, %v542_v56 }
 0x527   :  { %v548_v60 = vadd.f32 %v547_v58, %v541_v57 }
 0x529   :  { %v553_v61 = vadd.f32 %v696_v59, %v548_v60 }
 0x52b   :  { %802 = vtanh.f32 %v553_v61 }
 0x538   :  { %v803_v62 = vpop.eup %802 }
 0x539   :  { %769 = vmatmul.mubr.msk.f32.vlgmr.msra.gmra.mxu0 %vm559_vm5, %v803_v62 }
 0x5f9   :  { %v629_v1 = vpop.f32.mrf.mxu0 }
 0x5fa   :  { %v630_v2 = vadd.f32 %v697_v63, %v629_v1 }
 0x5fb   :  { %v770_v3 = vpop.f32.mrf.mxu0 }
 0x5fc   :  { %v634_v4 = vsel %vm633_vm6, %v630_v2, -inf }
 0x5fd   :  { %635 = vmax.xlane.f32.xlu0 %v634_v4 }
 0x613   :  { %646 = vrot.lane.b32.xlu0 %v955_v45, %s883_s22 }
 0x686   :  { %v636_v38 = vpop.xlane.xlu0 %635 }
 0x687   :  { %v637_v5 = vsub.f32 %v630_v2, %v636_v38 }
 0x689   :  { %v638_v0 = vmul.f32 1.442695, %v637_v5 }
 0x68a   :  { %v647_v11 = vpop.permute.xlu0 %646 }
 0x68b   :  { %804 = vpow2.f32 %v638_v0  ;;  %v657_v45 = vsel %vm559_vm5, %v931_v19, %v647_v11 }
 0x698   :  { %v805_v6 = vpop.eup %804 }
 0x699   :  { %v640_v7 = vsel %vm633_vm6, %v805_v6, 0.0 }
 0x69a   :  { %641 = vadd.xlane.f32.xlu1 %v640_v7 }
 0x6ab   :  { %650 = vrot.lane.b32.xlu1 %v934_v20, %s884_s23 }
 0x723   :  { %v642_v8 = vpop.xlane.xlu1 %641 }
 0x724   :  { %806 = vrcp.f32 %v642_v8 }
 0x727   :  { %v651_v12 = vpop.permute.xlu1 %650 }
 0x728   :  { %v659_v13 = vsel %vm658_vm7, %v657_v45, %v651_v12 }
 0x729   :  { %v661_v14 = vsel %vm660_vm8, %v659_v13, %v535_v50 }
 0x72a   :  { %v663_v15 = vsel %vm662_vm9, %v661_v14, %v542_v56 }
 0x731   :  { %v807_v9 = vpop.eup %806 }
 0x732   :  { %v644_v10 = vmul.f32 %v807_v9, %v805_v6 }
 0x734   :  { %654 = vrot.lane.b32.xlu1 %v644_v10, %s885_s24 }
 0x7a6   :  { %v655_v20 = vpop.permute.xlu1 %654 }
 0x7a7   :  { %v665_v16 = vsel %vm664_vm10, %v663_v15, %v655_v20 }
 0x7a8   :  { %v667_v17 = vsel %vm666_vm11, %v665_v16, 0.0 }
 0x7a9   :  { %668 = vst [vmem:[#allocation7] sm:$0xff] %v667_v17 }
 0x7aa   :  { %859 = shalt.err (!%p856_p0)
}
 0x7ab   :  { %678 = dma.vmem_to_hbm [thread:$0]  %s676_s26, 128, %s978_s2, [#allocation4]  }
 0x7ac   :  { %872 = dma.done.wait [#allocation4], 128  }
 0x7ad   :  { %873 = vsyncadd [#allocation4], 4294967168 }
 0x7ae   :  { %682 = vsyncpa [#allocation3], 1 }
 0x7af   :  { %683 = vsyncpa [#allocation6], 1 }
 0x7b0   :  { %684 = vsyncpa [#allocation4], 1 }

</bundles_post_ra>
